<compile_context>
chip_gen: v7x
topology: tpu7x:2x2x1
jax: 0.10.0
libtpu: 0.0.40
codegen_flags: <defaults>
</compile_context>

<pallas_src>
import functools

import jax
import jax.numpy as jnp
from jax.experimental import pallas as pl
from jax.experimental.pallas import tpu as pltpu


def _round_up(n, m):
    return ((n + m - 1) // m) * m


def _physical_vmem_bytes():
    """Physical VMEM per core; generation-aware fallback if the query fails."""
    try:
        v = getattr(pltpu.get_tpu_info(), "vmem_capacity_bytes", None)
        if v:
            return int(v)
    except Exception:
        pass
    kind = ""
    try:
        kind = jax.devices()[0].device_kind.lower()
    except Exception:
        pass
    if any(t in kind for t in ("v4", "v5", "v6")):
        return 128 * 1024 * 1024
    return 64 * 1024 * 1024          # v7x-safe default


# ---------------------------------------------------------------------------
# Kernels
# ---------------------------------------------------------------------------
def _scse_single_kernel(x_ref, w1t_ref, b1_ref, w2_ref, b2_ref, wspa_ref,
                        out_ref, *, inv_hw):
    """Whole (C, HW) slab per batch: pool + channel SE + spatial SE + gate."""
    x = x_ref[0].astype(jnp.float32)                          # (C, HW)
    pooled = jnp.sum(x, axis=1, keepdims=True) * inv_hw       # (C, 1)
    # channel excitation as VPU broadcast-multiplies + reductions (no MXU)
    h = jnp.sum(w1t_ref[...] * pooled, axis=0, keepdims=True) + b1_ref[...]
    h = jnp.maximum(h, 0.0)                                   # (1, Cr)
    chn = jnp.sum(w2_ref[...] * h, axis=1, keepdims=True) + b2_ref[...]
    chn = jax.nn.sigmoid(chn)                                 # (C, 1)
    # spatial SE (1x1 conv, no bias) as a cross-sublane reduction
    spa = jax.nn.sigmoid(jnp.sum(x * wspa_ref[...], axis=0, keepdims=True))
    out_ref[0] = ((x * chn) * spa).astype(out_ref.dtype)


def _scse_gate_kernel(x_ref, chn_ref, wspa_ref, out_ref):
    """HW-tiled gating: chn precomputed in XLA; spa per tile on the VPU."""
    x = x_ref[0].astype(jnp.float32)                          # (Cp, THW)
    spa = jax.nn.sigmoid(jnp.sum(x * wspa_ref[...], axis=0, keepdims=True))
    out_ref[0] = ((x * chn_ref[0]) * spa).astype(out_ref.dtype)


# ---------------------------------------------------------------------------
# Wrapper
# ---------------------------------------------------------------------------
def scse_block(x_nchw, w1, b1, w2, b2, w_spa, *, vmem_budget_bytes=None,
               tile_lanes=None):
    """ModifiedSCSEBlock forward.  x_nchw: (B, C, H, W) -> (B, C, H, W).

    w1: (C//r, C), b1: (C//r,), w2: (C, C//r), b2: (C,),
    w_spa: (C,)  (Conv2d(C, 1, 1, bias=False) weight flattened).
    tile_lanes (optional): override the HW tile width (multiple of 128) used
    by the two-pass path — mostly for testing/tuning.
    """
    B, C, H, W = x_nchw.shape
    HW = H * W
    Cr = w1.shape[0]
    dtype = x_nchw.dtype
    esize = jnp.dtype(dtype).itemsize
    f32 = jnp.float32
    inv_hw = 1.0 / float(HW)

    phys_vmem = _physical_vmem_bytes()
    if vmem_budget_bytes is None:
        vmem_budget_bytes = int(phys_vmem * 0.8)
    vmem_budget_bytes = int(vmem_budget_bytes)

    def _vmem_limit(need):
        # 20% headroom for Mosaic-internal temporaries; clamp to ~95% physical.
        return int(min(max(int(need) * 6 // 5, 32 * 1024 * 1024),
                       int(phys_vmem * 0.95)))

    x3 = x_nchw.reshape(B, C, HW)
    w_bytes = 4 * (2 * C * Cr + Cr + 2 * C)
    # in-kernel f32 temporaries: ~1 f32 slab for f32 input, ~2 for bf16/int8
    tmp_per_elem = 4 * (2 if esize < 4 else 1)
    slab_io = C * HW * esize
    single_need = 4 * slab_io + tmp_per_elem * C * HW + 2 * w_bytes + (2 << 20)

    # ------------- single-pass path: whole slab, NO host-side padding --------
    if single_need <= vmem_budget_bytes:
        # NOTE(v7x): for B==1 the two-pass gate path spreads work over both
        # TensorCores; keep single-pass as the default and benchmark if needed.
        w1t = w1.T.astype(f32)                       # (C, Cr)
        b1r = b1.reshape(1, Cr).astype(f32)          # (1, Cr)
        w2c = w2.astype(f32)                         # (C, Cr)
        b2c = b2.reshape(C, 1).astype(f32)           # (C, 1)
        wsp = w_spa.reshape(C, 1).astype(f32)        # (C, 1)
        out = pl.pallas_call(
            functools.partial(_scse_single_kernel, inv_hw=inv_hw),
            out_shape=jax.ShapeDtypeStruct((B, C, HW), dtype),
            grid_spec=pltpu.PrefetchScalarGridSpec(
                num_scalar_prefetch=0,
                grid=(B,),
                in_specs=[
                    pl.BlockSpec((1, C, HW), lambda b: (b, 0, 0)),
                    pl.BlockSpec((C, Cr), lambda b: (0, 0)),
                    pl.BlockSpec((1, Cr), lambda b: (0, 0)),
                    pl.BlockSpec((C, Cr), lambda b: (0, 0)),
                    pl.BlockSpec((C, 1), lambda b: (0, 0)),
                    pl.BlockSpec((C, 1), lambda b: (0, 0)),
                ],
                out_specs=pl.BlockSpec((1, C, HW), lambda b: (b, 0, 0)),
            ),
            compiler_params=pltpu.CompilerParams(
                dimension_semantics=("parallel",),
                vmem_limit_bytes=_vmem_limit(single_need)),
            cost_estimate=pl.CostEstimate(
                flops=int(5 * B * C * HW),
                transcendentals=int(B * (HW + C + Cr)),
                bytes_accessed=int(2 * B * slab_io + w_bytes)),
            input_output_aliases={0: 0},
        )(x3, w1t, b1r, w2c, b2c, wsp)
        return out.reshape(B, C, H, W)

    # ------------- two-pass path: channel SE in XLA + HW-tiled Pallas gate ---
    # Channel pooling + tiny SE MLP run in XLA (the mean fuses into the
    # upstream producer under jit) so x is read from HBM by Pallas only once.
    pooled = jnp.mean(x3.astype(f32), axis=2)                        # (B, C)
    hmid = jax.nn.relu(pooled @ w1.T.astype(f32) + b1.astype(f32))   # (B, Cr)
    chn = jax.nn.sigmoid(hmid @ w2.T.astype(f32) + b2.astype(f32))   # (B, C)

    pack = {4: 8, 2: 16, 1: 32}.get(esize, 8)        # sublane pack per dtype
    Cp = _round_up(C, pack)
    HWp128 = _round_up(HW, 128)
    n128 = HWp128 // 128

    if tile_lanes is not None:
        THW = min(_round_up(int(tile_lanes), 128), HWp128)
    else:
        # per-128-lane VMEM cost of one gate step: 2x in + 2x out blocks
        # (double-buffered) + f32 temporaries.
        per_lane_block = Cp * 128 * (4 * esize + tmp_per_elem)
        budget_blocks = max(0, vmem_budget_bytes - 8 * Cp * 4 - (1 << 20))
        tiles_max = max(1, min(n128, budget_blocks // per_lane_block))
        best_div = 1
        for d in range(1, tiles_max + 1):
            if n128 % d == 0:
                best_div = d
        if 2 * best_div >= tiles_max:
            THW = best_div * 128      # good divisor of HWp128: minimal padding
        else:
            THW = tiles_max * 128     # pad HW up so tiles stay near-max size
    HWp = _round_up(HW, THW)
    nT = HWp // THW

    xpad = jnp.pad(x3, ((0, 0), (0, Cp - C), (0, HWp - HW)))
    chn_p = jnp.zeros((B, Cp, 1), f32).at[:, :C, 0].set(chn)
    wsp_p = jnp.zeros((Cp, 1), f32).at[:C, 0].set(w_spa.reshape(C).astype(f32))

    gate_need = Cp * THW * (4 * esize + tmp_per_elem) + 16 * Cp + (2 << 20)
    out = pl.pallas_call(
        _scse_gate_kernel,
        out_shape=jax.ShapeDtypeStruct((B, Cp, HWp), dtype),
        grid_spec=pltpu.PrefetchScalarGridSpec(
            num_scalar_prefetch=0,
            grid=(B, nT),
            in_specs=[
                pl.BlockSpec((1, Cp, THW), lambda b, t: (b, 0, t)),
                pl.BlockSpec((1, Cp, 1), lambda b, t: (b, 0, 0)),
                pl.BlockSpec((Cp, 1), lambda b, t: (0, 0)),
            ],
            out_specs=pl.BlockSpec((1, Cp, THW), lambda b, t: (b, 0, t)),
        ),
        compiler_params=pltpu.CompilerParams(
            dimension_semantics=("parallel", "parallel"),
            vmem_limit_bytes=_vmem_limit(gate_need)),
        cost_estimate=pl.CostEstimate(
            flops=int(4 * B * Cp * HWp),
            transcendentals=int(B * HWp),
            bytes_accessed=int(2 * B * Cp * HWp * esize + 4 * B * Cp)),
        input_output_aliases={0: 0},
    )(xpad, chn_p, wsp_p)
    return out[:, :C, :HW].reshape(B, C, H, W)


# ---------------------------------------------------------------------------
# Pure-JAX reference (matches ModifiedSCSEBlock.forward)
# ---------------------------------------------------------------------------
def scse_block_ref(x, w1, b1, w2, b2, w_spa):
    B, C, H, W = x.shape
    pooled = jnp.mean(x, axis=(2, 3))                          # (B, C)
    h = jax.nn.relu(pooled @ w1.T + b1)                        # (B, Cr)
    chn = jax.nn.sigmoid(h @ w2.T + b2).reshape(B, C, 1, 1)
    spa = jax.nn.sigmoid(jnp.einsum("bchw,c->bhw", x, w_spa.reshape(C)))
    return x * chn * spa.reshape(B, 1, H, W)


# ---------------------------------------------------------------------------
# Decoder glue (upsample / conv+BN stages are plain JAX around the kernel)
# ---------------------------------------------------------------------------
def _upsample_bilinear_x2_align_corners(x):
    """Matches F.upsample(x, scale_factor=2, mode='bilinear', align_corners=True)."""
    B, C, H, W = x.shape

    def coords(n_in, n_out):
        if n_in == 1:
            src = jnp.zeros((n_out,), jnp.float32)
        else:
            src = jnp.arange(n_out, dtype=jnp.float32) * ((n_in - 1) / (n_out - 1))
        lo = jnp.clip(jnp.floor(src).astype(jnp.int32), 0, n_in - 1)
        hi = jnp.clip(lo + 1, 0, n_in - 1)
        frac = src - lo.astype(jnp.float32)
        return lo, hi, frac

    hlo, hhi, hf = coords(H, 2 * H)
    wlo, whi, wf = coords(W, 2 * W)
    xh = (x[:, :, hlo, :] * (1.0 - hf)[None, None, :, None]
          + x[:, :, hhi, :] * hf[None, None, :, None])
    return (xh[:, :, :, wlo] * (1.0 - wf)[None, None, None, :]
            + xh[:, :, :, whi] * wf[None, None, None, :])


def _fold_bn(conv_w, conv_b, gamma, beta, mean, var, eps=1e-5):
    scale = gamma / jnp.sqrt(var + eps)
    return conv_w * scale[:, None, None, None], (conv_b - mean) * scale + beta


def _conv_bn_relu(x, w, b):
    y = jax.lax.conv_general_dilated(
        x, w, window_strides=(1, 1), padding="SAME",
        dimension_numbers=("NCHW", "OIHW", "NCHW"))
    return jax.nn.relu(y + b[None, :, None, None])


def decoder_forward(params, x, e=None, *, use_pallas_scse=True):
    """Decoder.forward: upsample x2 -> concat(e) -> conv-bn-relu x2 -> SCSE."""
    # TODO(synk): the bilinear upsample and 3x3 Conv+BatchNorm stages are left
    # to plain JAX/XLA (BN folded into the conv); only the SCSE gating block
    # runs as a Pallas kernel.
    x = _upsample_bilinear_x2_align_corners(x)
    if e is not None:
        x = jnp.concatenate([x, e], axis=1)
    x = _conv_bn_relu(x, params["w_c1"], params["b_c1"])
    x = _conv_bn_relu(x, params["w_c2"], params["b_c2"])
    scse = scse_block if use_pallas_scse else scse_block_ref
    return scse(x, params["w1"], params["b1"], params["w2"], params["b2"],
                params["w_spa"])


# ---------------------------------------------------------------------------
if __name__ == "__main__":
    # ---- SCSE kernel checks -------------------------------------------------
    B, C, H, W = 2, 4, 16, 16
    reduction = 2
    Cr = C // reduction

    key = jax.random.PRNGKey(0)
    kx, kw1, kb1, kw2, kb2, kws = jax.random.split(key, 6)
    x = jax.random.normal(kx, (B, C, H, W), dtype=jnp.float32)
    w1 = jax.random.normal(kw1, (Cr, C), dtype=jnp.float32) * 0.5
    b1 = jax.random.normal(kb1, (Cr,), dtype=jnp.float32) * 0.1
    w2 = jax.random.normal(kw2, (C, Cr), dtype=jnp.float32) * 0.5
    b2 = jax.random.normal(kb2, (C,), dtype=jnp.float32) * 0.1
    w_spa = jax.random.normal(kws, (C,), dtype=jnp.float32) * 0.5

    ref = scse_block_ref(x, w1, b1, w2, b2, w_spa)

    scse_fast = jax.jit(scse_block)
    out = jax.block_until_ready(scse_fast(x, w1, b1, w2, b2, w_spa))
    assert out.shape == (B, C, H, W)
    assert jnp.allclose(out, ref, atol=2e-5, rtol=2e-5)

    # force the two-pass HW-tiled path (the path taken for large slabs / v7x)
    scse_tiled = jax.jit(functools.partial(scse_block, vmem_budget_bytes=1))
    out_tiled = jax.block_until_ready(scse_tiled(x, w1, b1, w2, b2, w_spa))
    assert jnp.allclose(out_tiled, ref, atol=2e-5, rtol=2e-5)

    # non-aligned C / HW (exercises the unpadded single pass + padded tiles)
    C2, H2, W2 = 6, 15, 15
    Cr2 = C2 // reduction
    k2 = jax.random.split(jax.random.PRNGKey(2), 6)
    x2 = jax.random.normal(k2[0], (B, C2, H2, W2), dtype=jnp.float32)
    w1_2 = jax.random.normal(k2[1], (Cr2, C2), dtype=jnp.float32) * 0.5
    b1_2 = jax.random.normal(k2[2], (Cr2,), dtype=jnp.float32) * 0.1
    w2_2 = jax.random.normal(k2[3], (C2, Cr2), dtype=jnp.float32) * 0.5
    b2_2 = jax.random.normal(k2[4], (C2,), dtype=jnp.float32) * 0.1
    ws_2 = jax.random.normal(k2[5], (C2,), dtype=jnp.float32) * 0.5
    ref2 = scse_block_ref(x2, w1_2, b1_2, w2_2, b2_2, ws_2)
    out2 = jax.block_until_ready(scse_fast(x2, w1_2, b1_2, w2_2, b2_2, ws_2))
    assert jnp.allclose(out2, ref2, atol=2e-5, rtol=2e-5)
    out2t = jax.block_until_ready(scse_tiled(x2, w1_2, b1_2, w2_2, b2_2, ws_2))
    assert jnp.allclose(out2t, ref2, atol=2e-5, rtol=2e-5)

    # ragged tiled path: HW = 896 (7 * 128) with a forced 384-lane tile so the
    # HW axis is padded up to a multiple of the tile (non-divisor branch)
    H3, W3 = 28, 32
    x3c = jax.random.normal(jax.random.PRNGKey(3), (B, C, H3, W3), jnp.float32)
    ref3 = scse_block_ref(x3c, w1, b1, w2, b2, w_spa)
    scse_ragged = jax.jit(functools.partial(scse_block, vmem_budget_bytes=1,
                                            tile_lanes=384))
    out3 = jax.block_until_ready(scse_ragged(x3c, w1, b1, w2, b2, w_spa))
    assert jnp.allclose(out3, ref3, atol=2e-5, rtol=2e-5)

    # ---- full Decoder forward demo -------------------------------------------
    Bd, Cx, Ce, Hs, Ws = 2, 3, 1, 8, 8
    in_ch, mid_ch, out_ch = Cx + Ce, 6, C          # out_ch == C: reuse SCSE params
    kd = jax.random.split(jax.random.PRNGKey(1), 14)
    xd = jax.random.normal(kd[0], (Bd, Cx, Hs, Ws), dtype=jnp.float32)
    e = jax.random.normal(kd[1], (Bd, Ce, 2 * Hs, 2 * Ws), dtype=jnp.float32)
    cw1 = jax.random.normal(kd[2], (mid_ch, in_ch, 3, 3), jnp.float32) * 0.2
    cb1 = jax.random.normal(kd[3], (mid_ch,), jnp.float32) * 0.1
    g1 = 1.0 + 0.1 * jax.random.normal(kd[4], (mid_ch,), jnp.float32)
    be1 = 0.1 * jax.random.normal(kd[5], (mid_ch,), jnp.float32)
    m1 = 0.1 * jax.random.normal(kd[6], (mid_ch,), jnp.float32)
    v1 = 0.5 + jax.random.uniform(kd[7], (mid_ch,), jnp.float32)
    cw2 = jax.random.normal(kd[8], (out_ch, mid_ch, 3, 3), jnp.float32) * 0.2
    cb2 = jax.random.normal(kd[9], (out_ch,), jnp.float32) * 0.1
    g2 = 1.0 + 0.1 * jax.random.normal(kd[10], (out_ch,), jnp.float32)
    be2 = 0.1 * jax.random.normal(kd[11], (out_ch,), jnp.float32)
    m2 = 0.1 * jax.random.normal(kd[12], (out_ch,), jnp.float32)
    v2 = 0.5 + jax.random.uniform(kd[13], (out_ch,), jnp.float32)
    w_c1, b_c1 = _fold_bn(cw1, cb1, g1, be1, m1, v1)
    w_c2, b_c2 = _fold_bn(cw2, cb2, g2, be2, m2, v2)
    params = dict(w_c1=w_c1, b_c1=b_c1, w_c2=w_c2, b_c2=b_c2,
                  w1=w1, b1=b1, w2=w2, b2=b2, w_spa=w_spa)

    dec_out = jax.block_until_ready(jax.jit(decoder_forward)(params, xd, e))
    dec_ref = decoder_forward(params, xd, e, use_pallas_scse=False)
    assert dec_out.shape == (Bd, out_ch, 2 * Hs, 2 * Ws)
    assert jnp.allclose(dec_out, dec_ref, atol=1e-4, rtol=1e-4)

    print("KERNEL_OK")
</pallas_src>

<mosaic_0001>
module attributes {stable_mosaic.version = 11 : i64} {
  func.func @_scse_single_kernel(%arg0: i32, %arg1: memref<1x4x256xf32, #tpu.memory_space<vmem>>, %arg2: memref<4x2xf32, #tpu.memory_space<vmem>>, %arg3: memref<1x2xf32, #tpu.memory_space<vmem>>, %arg4: memref<4x2xf32, #tpu.memory_space<vmem>>, %arg5: memref<4x1xf32, #tpu.memory_space<vmem>>, %arg6: memref<4x1xf32, #tpu.memory_space<vmem>>, %arg7: memref<1x4x256xf32, #tpu.memory_space<vmem>>) attributes {dimension_semantics = [#tpu.dimension_semantics<parallel>], iteration_bounds = array<i64: 2>, scalar_prefetch = 0 : i64, scratch_operands = 0 : i64, tpu.core_type = #tpu.core_type<tc>, window_params = [{transform_indices = @transform_0, window_bounds = array<i64: 1, 4, 256>}, {pipeline_mode = #tpu.pipeline_mode<synchronous>, transform_indices = @transform_1, window_bounds = array<i64: 4, 2>}, {pipeline_mode = #tpu.pipeline_mode<synchronous>, transform_indices = @transform_2, window_bounds = array<i64: 1, 2>}, {pipeline_mode = #tpu.pipeline_mode<synchronous>, transform_indices = @transform_3, window_bounds = array<i64: 4, 2>}, {pipeline_mode = #tpu.pipeline_mode<synchronous>, transform_indices = @transform_4, window_bounds = array<i64: 4, 1>}, {pipeline_mode = #tpu.pipeline_mode<synchronous>, transform_indices = @transform_5, window_bounds = array<i64: 4, 1>}, {transform_indices = @transform_6, window_bounds = array<i64: 1, 4, 256>}]} {
    %c0 = arith.constant 0 : index
    %c0_0 = arith.constant 0 : index
    %c0_1 = arith.constant 0 : index
    %0 = vector.load %arg1[%c0, %c0_0, %c0_1] : memref<1x4x256xf32, #tpu.memory_space<vmem>>, vector<1x4x256xf32>
    %1 = vector.shape_cast %0 : vector<1x4x256xf32> to vector<4x256xf32>
    %cst = arith.constant dense<0.000000e+00> : vector<4xf32>
    %2 = vector.multi_reduction <add>, %1, %cst [1] : vector<4x256xf32> to vector<4xf32>
    %3 = vector.shape_cast %2 : vector<4xf32> to vector<4x1xf32>
    %cst_2 = arith.constant 3.906250e-03 : f32
    %4 = vector.broadcast %cst_2 : f32 to vector<4x1xf32>
    %5 = arith.mulf %3, %4 : vector<4x1xf32>
    %c0_3 = arith.constant 0 : index
    %c0_4 = arith.constant 0 : index
    %6 = vector.load %arg2[%c0_3, %c0_4] : memref<4x2xf32, #tpu.memory_space<vmem>>, vector<4x2xf32>
    %7 = vector.broadcast %5 : vector<4x1xf32> to vector<4x2xf32>
    %8 = arith.mulf %6, %7 : vector<4x2xf32>
    %cst_5 = arith.constant dense<0.000000e+00> : vector<2xf32>
    %9 = vector.multi_reduction <add>, %8, %cst_5 [0] : vector<4x2xf32> to vector<2xf32>
    %10 = vector.shape_cast %9 : vector<2xf32> to vector<1x2xf32>
    %c0_6 = arith.constant 0 : index
    %c0_7 = arith.constant 0 : index
    %11 = vector.load %arg3[%c0_6, %c0_7] : memref<1x2xf32, #tpu.memory_space<vmem>>, vector<1x2xf32>
    %12 = arith.addf %10, %11 : vector<1x2xf32>
    %cst_8 = arith.constant 0.000000e+00 : f32
    %13 = vector.broadcast %cst_8 : f32 to vector<1x2xf32>
    %14 = arith.maximumf %12, %13 : vector<1x2xf32>
    %c0_9 = arith.constant 0 : index
    %c0_10 = arith.constant 0 : index
    %15 = vector.load %arg4[%c0_9, %c0_10] : memref<4x2xf32, #tpu.memory_space<vmem>>, vector<4x2xf32>
    %16 = vector.broadcast %14 : vector<1x2xf32> to vector<4x2xf32>
    %17 = arith.mulf %15, %16 : vector<4x2xf32>
    %cst_11 = arith.constant dense<0.000000e+00> : vector<4xf32>
    %18 = vector.multi_reduction <add>, %17, %cst_11 [1] : vector<4x2xf32> to vector<4xf32>
    %19 = vector.shape_cast %18 : vector<4xf32> to vector<4x1xf32>
    %c0_12 = arith.constant 0 : index
    %c0_13 = arith.constant 0 : index
    %20 = vector.load %arg5[%c0_12, %c0_13] : memref<4x1xf32, #tpu.memory_space<vmem>>, vector<4x1xf32>
    %21 = arith.addf %19, %20 : vector<4x1xf32>
    %22 = arith.negf %21 : vector<4x1xf32>
    %23 = math.exp %22 : vector<4x1xf32>
    %cst_14 = arith.constant 1.000000e+00 : f32
    %24 = vector.broadcast %cst_14 : f32 to vector<4x1xf32>
    %25 = arith.addf %24, %23 : vector<4x1xf32>
    %26 = arith.divf %24, %25 : vector<4x1xf32>
    %c0_15 = arith.constant 0 : index
    %c0_16 = arith.constant 0 : index
    %27 = vector.load %arg6[%c0_15, %c0_16] : memref<4x1xf32, #tpu.memory_space<vmem>>, vector<4x1xf32>
    %28 = vector.broadcast %27 : vector<4x1xf32> to vector<4x256xf32>
    %29 = arith.mulf %1, %28 : vector<4x256xf32>
    %cst_17 = arith.constant dense<0.000000e+00> : vector<256xf32>
    %30 = vector.multi_reduction <add>, %29, %cst_17 [0] : vector<4x256xf32> to vector<256xf32>
    %31 = vector.shape_cast %30 : vector<256xf32> to vector<1x256xf32>
    %32 = arith.negf %31 : vector<1x256xf32>
    %33 = math.exp %32 : vector<1x256xf32>
    %cst_18 = arith.constant 1.000000e+00 : f32
    %34 = vector.broadcast %cst_18 : f32 to vector<1x256xf32>
    %35 = arith.addf %34, %33 : vector<1x256xf32>
    %36 = arith.divf %34, %35 : vector<1x256xf32>
    %37 = vector.broadcast %26 : vector<4x1xf32> to vector<4x256xf32>
    %38 = arith.mulf %1, %37 : vector<4x256xf32>
    %39 = vector.broadcast %36 : vector<1x256xf32> to vector<4x256xf32>
    %40 = arith.mulf %38, %39 : vector<4x256xf32>
    %c0_19 = arith.constant 0 : index
    %c0_20 = arith.constant 0 : index
    %c0_21 = arith.constant 0 : index
    %41 = vector.load %arg7[%c0_19, %c0_20, %c0_21] : memref<1x4x256xf32, #tpu.memory_space<vmem>>, vector<1x4x256xf32>
    %42 = vector.shape_cast %41 : vector<1x4x256xf32> to vector<4x256xf32>
    %43 = vector.shape_cast %40 : vector<4x256xf32> to vector<1x4x256xf32>
    tpu.vector_store %arg7[%c0_19, %c0_20, %c0_21], %43 {strides = array<i32>} : memref<1x4x256xf32, #tpu.memory_space<vmem>>, vector<1x4x256xf32>,
    return
  }
  func.func @transform_0(%arg0: i32) -> (i32, i32, i32) {
    %c0_i32 = arith.constant 0 : i32
    %c0_i32_0 = arith.constant 0 : i32
    %c0_i32_1 = arith.constant 0 : i32
    return %arg0, %c0_i32, %c0_i32_0 : i32, i32, i32
  }
  func.func @transform_1(%arg0: i32) -> (i32, i32) {
    %c0_i32 = arith.constant 0 : i32
    %c0_i32_0 = arith.constant 0 : i32
    %c0_i32_1 = arith.constant 0 : i32
    return %c0_i32, %c0_i32_0 : i32, i32
  }
  func.func @transform_2(%arg0: i32) -> (i32, i32) {
    %c0_i32 = arith.constant 0 : i32
    %c0_i32_0 = arith.constant 0 : i32
    %c0_i32_1 = arith.constant 0 : i32
    return %c0_i32, %c0_i32_0 : i32, i32
  }
  func.func @transform_3(%arg0: i32) -> (i32, i32) {
    %c0_i32 = arith.constant 0 : i32
    %c0_i32_0 = arith.constant 0 : i32
    %c0_i32_1 = arith.constant 0 : i32
    return %c0_i32, %c0_i32_0 : i32, i32
  }
  func.func @transform_4(%arg0: i32) -> (i32, i32) {
    %c0_i32 = arith.constant 0 : i32
    %c0_i32_0 = arith.constant 0 : i32
    %c0_i32_1 = arith.constant 0 : i32
    return %c0_i32, %c0_i32_0 : i32, i32
  }
  func.func @transform_5(%arg0: i32) -> (i32, i32) {
    %c0_i32 = arith.constant 0 : i32
    %c0_i32_0 = arith.constant 0 : i32
    %c0_i32_1 = arith.constant 0 : i32
    return %c0_i32, %c0_i32_0 : i32, i32
  }
  func.func @transform_6(%arg0: i32) -> (i32, i32, i32) {
    %c0_i32 = arith.constant 0 : i32
    %c0_i32_0 = arith.constant 0 : i32
    %c0_i32_1 = arith.constant 0 : i32
    return %arg0, %c0_i32, %c0_i32_0 : i32, i32, i32
  }
}

</mosaic_0001>

<bundles_post_ra>
// kernel: scse_block.1
= control target key start
LH: loop header
LB: loop body
LE: loop exit
PB: predicated region body
PF: predicated region fallthrough
CT: control target
= control target key end

     0   :  { %s496_s21 = smov 0   ;;  %s548_s0 = inlined_call_operand.vmem [shape: f32[2,4,256], index: 0, kind: input, shape index: {}, may-alias: {0,6}]   ;;  %s549_s1 = inlined_call_operand.vmem [shape: f32[4,2], index: 1, kind: input, shape index: {}]   ;;  %s550_s2 = inlined_call_operand.vmem [shape: f32[1,2], index: 2, kind: input, shape index: {}]   ;;  %s551_s3 = inlined_call_operand.vmem [shape: f32[4,2], index: 3, kind: input, shape index: {}]   ;;  %s552_s4 = inlined_call_operand.vmem [shape: f32[4,1], index: 4, kind: input, shape index: {}]   ;;  %s553_s5 = inlined_call_operand.vmem [shape: f32[4,1], index: 5, kind: input, shape index: {}]   ;;  %s554_s6 = inlined_call_operand.vmem [shape: f32[2,4,256], index: 6, kind: output, shape index: {}, may-alias: {0,6}]  }
   0x1 LB: > { %s410_s22 = sadd.s32 4294967295, %s457_s21   ;;  %p414_p0 = scmp.ge.s32.totalorder %s457_s21, 1  ;;  %s457_s21 = sphi %s496_s21, %s16_s21  }
   0x2   : > { %p212_p1 = scmp.lt.s32.totalorder %s457_s21, 3 }
   0x4   : > { %p213_p2 = pnand %p414_p0, %p212_p1 }
   0x5   : > { %p242_p3 = scmp.lt.s32.totalorder (!%p213_p2), %s410_s22, 1  ;;  %vm256_vm0 = vcmask (!%p213_p2), 1043456   ;;  %v293_v5 = vld [vmem:[%s553_s5] sm:$0xf] (!%p213_p2)  ;;  %v459_v6 = vmov (!%p213_p2), 0   ;;  %vm265_vm1 = vcmask (!%p213_p2), 11264   ;;  %v277_v15 = vlaneseq (!%p213_p2) }
   0x6   : > { %216 = sbr.rel (%p213_p2) target bundleno = 495 (0x1ef), region = 44  ;;  %436 = vset.pattern.permute.xlu1 (!%p213_p2), %v459_v6  ;;  %437 = vset.pattern.permute.xlu0 (!%p213_p2), %v459_v6  ;;  %v263_v7 = vld [vmem:[%s549_s1] sm:$0xf] (!%p213_p2)  ;;  %v460_v35 = vmov (!%p213_p2), 839922192  }
   0x7   : > { %296 = vperm.xlu1 (!%p213_p2), %436, %v293_v5   ;;  %v278_v18 = vshrl.u32 (!%p213_p2), %v277_v15, 7  ;;  %v273_v19 = vld [vmem:[%s550_s2] sm:$0x1] (!%p213_p2)  ;;  %v299_v36 = vunpack.c.l.s4 (!%p213_p2), %v460_v35 }
   0x8   : > { %v276_v24 = vld [vmem:[%s551_s3] sm:$0xf] (!%p213_p2) }
   0x9   : > { %v279_v22 = vsub.s32 (!%p213_p2), 0, %v278_v18  ;;  %v285_v28 = vld [vmem:[%s552_s4] sm:$0xf] (!%p213_p2)  ;;  %v300_v37 = vunpack.c.0.s8 (!%p213_p2), %v299_v36 }
   0xb   : > { %v303_v38 = vsub.s32 (!%p213_p2), %v300_v37, %v278_v18 }
   0xd   : > { %s556_s22 = smov (!%p242_p3, %s410_s22), 1 }
   0xe   : > { %s424_s23 = sshll.u32 %s556_s22, 3 }
   0xf   : > { %s246_s26 = scalar_lea.vmem %s548_s0, %s424_s23  ;;  %s251_s15 = scalar_lea.vmem %s554_s6, %s424_s23 }
  0x10   : > { %v512_v0 = vld [vmem:[%s246_s26] sm:$0xff] }
  0x11   : > { %v254_v1 = vcombine.high %v512_v0, %v512_v0  ;;  %v257_v2 = vsel %vm256_vm0, %v512_v0, 0.0 }
  0x13   : > { %v258_v3 = vsel %vm256_vm0, %v254_v1, 0.0 }
  0x14   : > { %v259_v4 = vadd.f32 %v258_v3, %v257_v2 }
  0x16   : > { %260 = vadd.xlane.f32.xlu0 %v259_v4 }
  0x86   : > { %v297_v39 = vpop.permute.xlu1 %296 }
  0x87   : > { %v304_v40 = vrot.slane %v297_v39, %v303_v38 }
  0x89   : > { %v306_v41 = vmul.f32 %v304_v40, %v512_v0 }
  0x8b   : > { %v308_v42 = vcombine.high %v306_v41, %v306_v41  ;;  %v310_v43 = vsel %vm256_vm0, %v306_v41, 0.0 }
  0x8c   : > { %v311_v45 = vrot.slane %v310_v43, 4 }
  0x8d   : > { %v317_v44 = vsel %vm256_vm0, %v308_v42, 0.0 }
  0x8e   : > { %v318_v46 = vrot.slane %v317_v44, 4  ;;  %v312_v47 = vadd.f32 %v311_v45, %v310_v43 }
  0x90   : > { %v319_v48 = vadd.f32 %v318_v46, %v317_v44  ;;  %v313_v49 = vrot.slane %v312_v47, 2 }
  0x92   : > { %v320_v50 = vrot.slane %v319_v48, 2  ;;  %v314_v51 = vadd.f32 %v313_v49, %v312_v47 }
  0x94   : > { %v321_v52 = vadd.f32 %v320_v50, %v319_v48  ;;  %v315_v53 = vrot.slane %v314_v51, 1 }
  0x96   : > { %v322_v54 = vrot.slane %v321_v52, 1  ;;  %v316_v55 = vadd.f32 %v315_v53, %v314_v51 }
  0x98   : > { %v323_v56 = vadd.f32 %v322_v54, %v321_v52  ;;  %v420_v57 = vmul.f32 -1.442695, %v316_v55 }
  0x9a   : > { %v421_v58 = vmul.f32 -1.442695, %v323_v56 }
  0xa3   : > { %v261_v8 = vpop.xlane.xlu0 %260 }
  0xa4   : > { %v262_v9 = vmul.f32 0.00390625, %v261_v8 }
  0xa6   : > { %v264_v10 = vmul.f32 %v263_v7, %v262_v9 }
  0xa8   : > { %v266_v11 = vsel %vm265_vm1, %v264_v10, 0.0 }
  0xa9   : > { %v267_v12 = vrot.slane %v266_v11, 4 }
  0xab   : > { %v268_v13 = vadd.f32 %v267_v12, %v266_v11 }
  0xad   : > { %v269_v14 = vrot.slane %v268_v13, 2 }
  0xaf   : > { %v270_v16 = vadd.f32 %v269_v14, %v268_v13 }
  0xb1   : > { %v271_v17 = vrot.slane %v270_v16, 1 }
  0xb3   : > { %v272_v20 = vadd.f32 %v271_v17, %v270_v16 }
  0xb5   : > { %v274_v21 = vadd.f32 %v273_v19, %v272_v20 }
  0xb7   : > { %v275_v23 = vmax.f32 %v274_v21, 0.0 }
  0xb9   : > { %v280_v25 = vrot.slane %v275_v23, %v279_v22 }
  0xbb   : > { %v281_v26 = vmul.f32 %v280_v25, %v276_v24 }
  0xbd   : > { %v282_v27 = vsel %vm265_vm1, %v281_v26, 0.0 }
  0xbe   : > { %283 = vadd.xlane.f32.xlu0 %v282_v27 }
 0x14b   : > { %v284_v29 = vpop.xlane.xlu0 %283 }
 0x14c   : > { %v286_v30 = vadd.f32 %v285_v28, %v284_v29 }
 0x14e   : > { %v419_v31 = vmul.f32 -1.442695, %v286_v30 }
 0x150   : > { %439 = vpow2.f32 %v419_v31 }
 0x15a   : > { %v440_v32 = vpop.eup %439 }
 0x15b   : > { %v290_v33 = vadd.f32 1.0, %v440_v32 }
 0x15d   : > { %441 = vrcp.f32 %v290_v33 }
 0x15e   : > { %443 = vpow2.f32 %v420_v57 }
 0x15f   : > { %445 = vpow2.f32 %v421_v58 }
 0x167   : > { %v442_v34 = vpop.eup %441 }
 0x168   : > { %338 = vperm.xlu1 %436, %v442_v34   ;;  %v444_v59 = vpop.eup %443 }
 0x169   : > { %v446_v60 = vpop.eup %445  ;;  %v330_v61 = vadd.f32 1.0, %v444_v59 }
 0x16a   : > { %v331_v62 = vadd.f32 1.0, %v446_v60 }
 0x16b   : > { %447 = vrcp.f32 %v330_v61 }
 0x16c   : > { %449 = vrcp.f32 %v331_v62 }
 0x175   : > { %v448_v63 = vpop.eup %447 }
 0x176   : > { %v450_v1 = vpop.eup %449 }
 0x177   : > { %v351_v4 = vcombine.low %v448_v63, %v450_v1 }
 0x1e7   : > { %v339_v2 = vpop.permute.xlu1 %338 }
 0x1e8   : > { %v346_v3 = vrot.slane %v339_v2, %v303_v38 }
 0x1ea   : > { %v348_v5 = vmul.f32 %v346_v3, %v512_v0 }
 0x1ec   : > { %v353_v6 = vmul.f32 %v351_v4, %v348_v5 }
 0x1ee   : > { %354 = vst [vmem:[%s251_s15] sm:$0xff] %v353_v6 }
 0x1ef PF: > { %s16_s21 = sadd.s32 1, %s457_s21  }
 0x1f0   : > { %p13_p4 = scmp.ge.s32.totalorder %s16_s21, 4  }
 0x1f2   :  { %15 = sbr.rel (!%p13_p4) target bundleno = 1 (0x1), region = 74 }

</bundles_post_ra>
